<compile_context>
chip_gen: v7x
topology: tpu7x:2x2x1
jax: 0.10.0
libtpu: 0.0.40
codegen_flags: <defaults>
</compile_context>

<pallas_src>
import functools

import jax
import jax.numpy as jnp
from jax import lax
from jax.experimental import pallas as pl
from jax.experimental.pallas import tpu as pltpu


def _nearest_interp_kernel(r_ref, p_ref, rhs_ref, o_ref, *, chunk_n):
    # r_ref   : (1, C, N_pad)  field values for this batch (resident across g-tiles)
    # p_ref   : (1, N_pad, 8)  augmented bot coords [-2x, -2y, x^2+y^2, 0...]
    # rhs_ref : (8, TG)        precomputed rows [gx, gy, 1, 0...] (lane dense)
    # o_ref   : (1, C, TG)     lane-dense output tile
    rhs = rhs_ref[...]                                     # [8, TG]
    tg = rhs.shape[1]
    c = r_ref.shape[1]
    n_pad = p_ref.shape[1]
    num_chunks = n_pad // chunk_n

    def body(ci, carry):
        min_d, acc = carry
        start = ci * chunk_n
        if isinstance(start, jax.Array):                   # dynamic start -> hint alignment
            start = pl.multiple_of(start, chunk_n)
        p_chunk = p_ref[0, pl.ds(start, chunk_n), :]       # [cn, 8]
        r_chunk = r_ref[0, :, pl.ds(start, chunk_n)]       # [C, cn]

        # dist_eff[n, t] = ||p_n||^2 - 2 p_n . g_t   (MXU; ||g_t||^2 dropped)
        dist = lax.dot_general(
            p_chunk, rhs,
            dimension_numbers=(((1,), (0,)), ((), ())),
            preferred_element_type=jnp.float32)            # [cn, TG]

        # First-occurrence argmin inside the chunk (two sublane min-reductions).
        row = lax.broadcasted_iota(jnp.int32, dist.shape, 0)
        cmin = jnp.min(dist, axis=0, keepdims=True)        # [1, TG]
        cand = jnp.where(dist == cmin, row, chunk_n)
        best = jnp.min(cand, axis=0, keepdims=True)        # [1, TG]
        onehot = (row == best).astype(jnp.float32)         # [cn, TG]

        # Candidate gathered values for this chunk (exact 0/1 weights -> HIGHEST).
        val = lax.dot_general(
            r_chunk, onehot,
            dimension_numbers=(((1,), (0,)), ((), ())),
            precision=lax.Precision.HIGHEST,
            preferred_element_type=jnp.float32)            # [C, TG]

        # Earlier chunks win ties (strict <) -> global first-occurrence argmin.
        take = cmin < min_d                                # [1, TG]
        min_d = jnp.where(take, cmin, min_d)
        acc = jnp.where(take, val, acc)
        return min_d, acc

    init = (jnp.full((1, tg), jnp.inf, dtype=jnp.float32),
            jnp.zeros((c, tg), dtype=jnp.float32))
    if num_chunks == 1:
        _, acc = body(0, init)
    else:
        _, acc = lax.fori_loop(0, num_chunks, body, init,
                               unroll=bool(num_chunks <= 8))
    o_ref[0] = acc.astype(o_ref.dtype)


def _vmem_capacity_bytes():
    try:
        return int(pltpu.get_tpu_info().vmem_capacity_bytes)
    except Exception:
        return 128 * 1024 * 1024   # v5e/v6e physical VMEM fallback


def _choose_tile_g(G, chunk_n, B, budget_bytes):
    """Pick the grid-point tile size TG.

    Largest multiple of 128 (biased toward multiples of 512 for full MXU
    result width on v6e/v7x) that (a) divides G exactly (no padding / no
    post-kernel slice), (b) keeps the ~4 [chunk_n, TG] f32 chunk temporaries
    within budget_bytes, and (c) leaves >= 2 total grid programs so v7x
    megacore can split work across its two TensorCores.
    """
    cap = budget_bytes // max(1, 4 * chunk_n * 4)
    cap = max(128, min(8192, (cap // 128) * 128))
    for step in (512, 256, 128):
        t = (min(cap, G) // step) * step
        while t >= step:
            if G % t == 0 and B * (G // t) >= 2:
                return t, G
            t -= step
    # No exact divisor fits: pad the flattened grid axis.
    tile = min(cap, ((G + 127) // 128) * 128)
    if B * pl.cdiv(G, tile) < 2 and tile > 128:
        tile = max(128, ((tile // 2) // 128) * 128)
    g_pad = ((G + tile - 1) // tile) * tile
    return tile, g_pad


def predictor_interp2d_forward(R_pc, XY_pc, XY_grd, *, tile_g=None, chunk_n=None):
    """Nearest-neighbor 2-D interpolation of a point cloud onto a regular grid.

    Args:
      R_pc   : [B, C, N] field values at the observation bots.
      XY_pc  : [B, 2, N] (x, y) bot locations.
      XY_grd : [H, W, 2] regular grid locations.
    Returns:
      R_grd  : [B, C, H, W] nearest-neighbor interpolated field (float32).
    """
    B, C, N = R_pc.shape
    H, W, _ = XY_grd.shape
    G = H * W

    R_pc = R_pc.astype(jnp.float32)
    XY_pc = XY_pc.astype(jnp.float32)
    XY_grd = XY_grd.astype(jnp.float32)

    # Center coordinates on the grid mean: argmin-invariant shift that avoids
    # catastrophic cancellation in the ||p||^2 - 2 g.p expansion.
    grd = XY_grd.reshape(G, 2)
    center = jnp.mean(grd, axis=0)
    grd = grd - center[None, :]                            # [G, 2]
    pc = XY_pc - center[None, :, None]                     # [B, 2, N]

    # Bot-chunk size for the in-kernel reduction loop (bounds VMEM for any N).
    if chunk_n is None:
        chunk_n = 256 if N > 256 else ((N + 7) // 8) * 8
    chunk_n = max(8, ((chunk_n + 7) // 8) * 8)
    N_pad = ((N + chunk_n - 1) // chunk_n) * chunk_n

    # Per-chip temporary budget (v7x has half the VMEM of v5e/v6e).
    vmem_cap = _vmem_capacity_bytes()
    budget = max(4 * 1024 * 1024, min(12 * 1024 * 1024, vmem_cap // 10))

    if tile_g is None:
        tile_g, G_pad = _choose_tile_g(G, chunk_n, B, budget)
    else:
        tile_g = max(128, (tile_g // 128) * 128)
        G_pad = ((G + tile_g - 1) // tile_g) * tile_g

    # Precomputed distance-matmul RHS rows [gx, gy, 1, 0, 0, 0, 0, 0] (lane dense).
    gx, gy = grd[:, 0], grd[:, 1]
    ones = jnp.ones_like(gx)
    zeros = jnp.zeros_like(gx)
    rhs = jnp.stack([gx, gy, ones, zeros, zeros, zeros, zeros, zeros], axis=0)
    if G_pad != G:
        rhs = jnp.pad(rhs, ((0, 0), (0, G_pad - G)))       # [8, G_pad]

    # Augmented bot operand [-2x, -2y, x^2+y^2, 0...] (the -2 is folded in here
    # so the kernel does no rhs/lhs build work at all).
    px, py = pc[:, 0, :], pc[:, 1, :]
    psq = px * px + py * py
    zcol = jnp.zeros_like(px)
    p_aug = jnp.stack([-2.0 * px, -2.0 * py, psq, zcol, zcol, zcol, zcol, zcol],
                      axis=-1)                             # [B, N, 8]

    R_in = R_pc
    if N_pad != N:
        # Sentinel bots: enormous distance (never selected), zero field value.
        pad = N_pad - N
        p_pad = jnp.zeros((B, pad, 8), jnp.float32).at[:, :, 2].set(1e30)
        p_aug = jnp.concatenate([p_aug, p_pad], axis=1)
        R_in = jnp.concatenate([R_in, jnp.zeros((B, C, pad), R_in.dtype)], axis=2)

    grid = (B, G_pad // tile_g)

    # Explicit scoped-VMEM limit: double-buffered blocks + chunk temporaries
    # + carried state, with margin, capped well under physical VMEM.
    block_bytes = 2 * 4 * (C * N_pad + N_pad * 8 + 8 * tile_g + C * tile_g)
    temp_bytes = 4 * (6 * chunk_n * tile_g + (C + 2) * tile_g)
    vmem_limit = int(max(32 * 1024 * 1024,
                         min(0.75 * vmem_cap, 1.5 * (block_bytes + temp_bytes))))

    kernel = functools.partial(_nearest_interp_kernel, chunk_n=chunk_n)

    out_flat = pl.pallas_call(
        kernel,
        out_shape=jax.ShapeDtypeStruct((B, C, G_pad), R_pc.dtype),
        grid_spec=pltpu.PrefetchScalarGridSpec(
            num_scalar_prefetch=0,
            grid=grid,
            in_specs=[
                pl.BlockSpec((1, C, N_pad), lambda b, g: (b, 0, 0)),   # R_pc
                pl.BlockSpec((1, N_pad, 8), lambda b, g: (b, 0, 0)),   # P_aug
                pl.BlockSpec((8, tile_g), lambda b, g: (0, g)),        # rhs
            ],
            out_specs=pl.BlockSpec((1, C, tile_g), lambda b, g: (b, 0, g)),
        ),
        compiler_params=pltpu.CompilerParams(
            dimension_semantics=("parallel", "parallel"),
            vmem_limit_bytes=vmem_limit,
        ),
    )(R_in, p_aug, rhs)

    if G_pad != G:
        out_flat = out_flat[:, :, :G]
    return out_flat.reshape(B, C, H, W)


def _check_nearest(R_grd, R_pc, XY_pc, XY_grd, tol=1e-5):
    """Tie-robust check: every output value must equal the field value of some
    bot whose distance to that grid point is within tol of the true minimum
    (guards against f32 near-tie argmin flips between algebraic formulations)."""
    B, C, N = R_pc.shape
    H, W, _ = XY_grd.shape
    G = H * W
    grd = XY_grd.reshape(G, 2)
    diff = grd[None, :, None, :] - jnp.transpose(XY_pc, (0, 2, 1))[:, None, :, :]
    dist = jnp.sum(diff * diff, axis=-1)                        # [B, G, N]
    min_d = jnp.min(dist, axis=-1, keepdims=True)                # [B, G, 1]
    near = dist <= min_d + tol * (1.0 + min_d)                   # [B, G, N]
    out = R_grd.reshape(B, C, G)
    match = jnp.abs(out[:, :, :, None] - R_pc[:, :, None, :]) <= tol
    ok = jnp.any(match & near[:, None, :, :], axis=-1)           # [B, C, G]
    return bool(jnp.all(ok))


if __name__ == "__main__":
    key = jax.random.PRNGKey(0)
    k1, k2, k3, k4 = jax.random.split(key, 4)

    # regular 16x16 grid on [0, 1] x [0, 1]
    H, W = 16, 16
    xs = jnp.linspace(0.0, 1.0, W, dtype=jnp.float32)
    ys = jnp.linspace(0.0, 1.0, H, dtype=jnp.float32)
    gy, gx = jnp.meshgrid(ys, xs, indexing="ij")
    XY_grd = jnp.stack([gx, gy], axis=-1)                         # [H, W, 2]

    # Case 1: small shapes, single bot chunk, exact-divisor grid tile.
    B, C, N = 2, 4, 128
    R_pc = jax.random.normal(k1, (B, C, N), dtype=jnp.float32)
    XY_pc = jax.random.uniform(k2, (B, 2, N), dtype=jnp.float32)
    R_grd = jax.block_until_ready(predictor_interp2d_forward(R_pc, XY_pc, XY_grd))
    assert R_grd.shape == (B, C, H, W)
    assert _check_nearest(R_grd, R_pc, XY_pc, XY_grd)

    # Case 2: N not a multiple of the chunk (sentinel padding), multi-chunk
    # carried reduction, B=1 (forces the g-axis split for >=2 grid programs).
    B2, C2, N2 = 1, 3, 300
    R_pc2 = jax.random.normal(k3, (B2, C2, N2), dtype=jnp.float32)
    XY_pc2 = jax.random.uniform(k4, (B2, 2, N2), dtype=jnp.float32)
    R_grd2 = jax.block_until_ready(predictor_interp2d_forward(R_pc2, XY_pc2, XY_grd))
    assert R_grd2.shape == (B2, C2, H, W)
    assert _check_nearest(R_grd2, R_pc2, XY_pc2, XY_grd)

    print("KERNEL_OK")
</pallas_src>

<mosaic_0001>
module attributes {stable_mosaic.version = 11 : i64} {
  func.func @_nearest_interp_kernel(%arg0: i32, %arg1: i32, %arg2: memref<1x4x128xf32, #tpu.memory_space<vmem>>, %arg3: memref<1x128x8xf32, #tpu.memory_space<vmem>>, %arg4: memref<8x256xf32, #tpu.memory_space<vmem>>, %arg5: memref<1x4x256xf32, #tpu.memory_space<vmem>>) attributes {dimension_semantics = [#tpu.dimension_semantics<parallel>, #tpu.dimension_semantics<parallel>], iteration_bounds = array<i64: 2, 1>, scalar_prefetch = 0 : i64, scratch_operands = 0 : i64, tpu.core_type = #tpu.core_type<tc>, window_params = [{transform_indices = @transform_0, window_bounds = array<i64: 1, 4, 128>}, {transform_indices = @transform_1, window_bounds = array<i64: 1, 128, 8>}, {transform_indices = @transform_2, window_bounds = array<i64: 8, 256>}, {transform_indices = @transform_3, window_bounds = array<i64: 1, 4, 256>}]} {
    %c0 = arith.constant 0 : index
    %c0_0 = arith.constant 0 : index
    %0 = vector.load %arg4[%c0, %c0_0] : memref<8x256xf32, #tpu.memory_space<vmem>>, vector<8x256xf32>
    %cst = arith.constant 0x7F800000 : f32
    %1 = vector.broadcast %cst : f32 to vector<1x256xf32>
    %cst_1 = arith.constant 0.000000e+00 : f32
    %2 = vector.broadcast %cst_1 : f32 to vector<4x256xf32>
    %c0_2 = arith.constant 0 : index
    %c0_3 = arith.constant 0 : index
    %c0_4 = arith.constant 0 : index
    %3 = vector.load %arg3[%c0_2, %c0_3, %c0_4] : memref<1x128x8xf32, #tpu.memory_space<vmem>>, vector<1x128x8xf32>
    %4 = vector.shape_cast %3 : vector<1x128x8xf32> to vector<128x8xf32>
    %c0_5 = arith.constant 0 : index
    %c0_6 = arith.constant 0 : index
    %c0_7 = arith.constant 0 : index
    %5 = vector.load %arg2[%c0_5, %c0_6, %c0_7] : memref<1x4x128xf32, #tpu.memory_space<vmem>>, vector<1x4x128xf32>
    %6 = vector.shape_cast %5 : vector<1x4x128xf32> to vector<4x128xf32>
    %cst_8 = arith.constant dense<0.000000e+00> : vector<128x256xf32>
    %7 = tpu.matmul %4, %0, %cst_8 {dimension_numbers = #tpu.dot_dimension_numbers<[1], [0], [0], [1], [0, 0, 1, 1], [], []>} : vector<128x8xf32>, vector<8x256xf32>, vector<128x256xf32> -> vector<128x256xf32>
    %8 = tpu.iota {dimensions = array<i32: 0>} : vector<128x256xi32>
    %cst_9 = arith.constant dense<0x7F800000> : vector<256xf32>
    %9 = vector.multi_reduction <minimumf>, %7, %cst_9 [0] : vector<128x256xf32> to vector<256xf32>
    %10 = vector.shape_cast %9 : vector<256xf32> to vector<1x256xf32>
    %11 = vector.broadcast %10 : vector<1x256xf32> to vector<128x256xf32>
    %12 = arith.cmpf oeq, %7, %11 : vector<128x256xf32>
    %c128_i32 = arith.constant 128 : i32
    %13 = vector.broadcast %c128_i32 : i32 to vector<128x256xi32>
    %14 = arith.select %12, %8, %13 : vector<128x256xi1>, vector<128x256xi32>
    %cst_10 = arith.constant dense<2147483647> : vector<256xi32>
    %15 = vector.multi_reduction <minsi>, %14, %cst_10 [0] : vector<128x256xi32> to vector<256xi32>
    %16 = vector.shape_cast %15 : vector<256xi32> to vector<1x256xi32>
    %17 = vector.broadcast %16 : vector<1x256xi32> to vector<128x256xi32>
    %18 = arith.cmpi eq, %8, %17 : vector<128x256xi32>
    %19 = arith.extui %18 : vector<128x256xi1> to vector<128x256xi32>
    %20 = arith.sitofp %19 : vector<128x256xi32> to vector<128x256xf32>
    %cst_11 = arith.constant dense<0.000000e+00> : vector<4x256xf32>
    %21 = tpu.matmul %6, %20, %cst_11 {dimension_numbers = #tpu.dot_dimension_numbers<[1], [0], [0], [1], [0, 0, 1, 1], [], []>, precision = #tpu.contract_precision<fp32>} : vector<4x128xf32>, vector<128x256xf32>, vector<4x256xf32> -> vector<4x256xf32>
    %22 = arith.cmpf olt, %10, %1 : vector<1x256xf32>
    %23 = vector.shape_cast %22 : vector<1x256xi1> to vector<1x256xi1>
    %24 = vector.broadcast %23 : vector<1x256xi1> to vector<4x256xi1>
    %25 = arith.select %24, %21, %2 : vector<4x256xi1>, vector<4x256xf32>
    %c0_12 = arith.constant 0 : index
    %c0_13 = arith.constant 0 : index
    %c0_14 = arith.constant 0 : index
    %26 = vector.load %arg5[%c0_12, %c0_13, %c0_14] : memref<1x4x256xf32, #tpu.memory_space<vmem>>, vector<1x4x256xf32>
    %27 = vector.shape_cast %26 : vector<1x4x256xf32> to vector<4x256xf32>
    %28 = vector.shape_cast %25 : vector<4x256xf32> to vector<1x4x256xf32>
    tpu.vector_store %arg5[%c0_12, %c0_13, %c0_14], %28 {strides = array<i32>} : memref<1x4x256xf32, #tpu.memory_space<vmem>>, vector<1x4x256xf32>,
    return
  }
  func.func @transform_0(%arg0: i32, %arg1: i32) -> (i32, i32, i32) {
    %c0_i32 = arith.constant 0 : i32
    %c0_i32_0 = arith.constant 0 : i32
    %c0_i32_1 = arith.constant 0 : i32
    return %arg0, %c0_i32, %c0_i32_0 : i32, i32, i32
  }
  func.func @transform_1(%arg0: i32, %arg1: i32) -> (i32, i32, i32) {
    %c0_i32 = arith.constant 0 : i32
    %c0_i32_0 = arith.constant 0 : i32
    %c0_i32_1 = arith.constant 0 : i32
    return %arg0, %c0_i32, %c0_i32_0 : i32, i32, i32
  }
  func.func @transform_2(%arg0: i32, %arg1: i32) -> (i32, i32) {
    %c0_i32 = arith.constant 0 : i32
    %c0_i32_0 = arith.constant 0 : i32
    return %c0_i32, %arg1 : i32, i32
  }
  func.func @transform_3(%arg0: i32, %arg1: i32) -> (i32, i32, i32) {
    %c0_i32 = arith.constant 0 : i32
    %c0_i32_0 = arith.constant 0 : i32
    return %arg0, %c0_i32, %arg1 : i32, i32, i32
  }
}

</mosaic_0001>

<bundles_post_ra>
// kernel: tpu_custom_call.1
= control target key start
LH: loop header
LB: loop body
LE: loop exit
PB: predicated region body
PF: predicated region fallthrough
CT: control target
= control target key end

     0   :  { %8 = vsyncpa [#allocation3], 0  ;;  %s3564_s0 = inlined_call_operand.vmem [shape: f32[2,4,128], index: 0, kind: input, shape index: {}]   ;;  %s3565_s1 = inlined_call_operand.vmem [shape: f32[2,128,8], index: 1, kind: input, shape index: {}]   ;;  %s3566_s2 = inlined_call_operand.vmem [shape: f32[8,256], index: 2, kind: input, shape index: {}]   ;;  %s3567_s3 = inlined_call_operand.hbm [shape: f32[2,4,256], index: 3, kind: output, shape index: {}]  }
   0x1   :  { %10 = vsyncpa [#allocation3 + $0x1], 0  ;;  %s2254_s12 = smov 0   ;;  %s2256_s13 = smov 0  }
   0x2   :  { %s2258_s14 = smov 0   ;;  %s2260_s15 = smov 0  }
   0x3   :  { %s2262_s16 = smov 0   ;;  %s2264_s17 = smov 0  }
   0x4 LB: > { %s1731_s18 = sadd.s32 4294967295, %s2229_s17   ;;  %s1732_s19 = sadd.s32 4294967294, %s2229_s17   ;;  %s2229_s17 = sphi %s2264_s17, %s16_s17   ;;  %s2225_s16 = sphi %s2262_s16, %s3757_s16   ;;  %s2221_s15 = sphi %s2260_s15, %s3756_s15   ;;  %s2217_s14 = sphi %s2258_s14, %s3755_s14   ;;  %s2213_s13 = sphi %s2256_s13, %s3754_s13   ;;  %s2209_s12 = sphi %s2254_s12, %s3753_s12  }
   0x5   : > { %s28_s20 = sadd.s32 1, %s2225_s16  ;;  %s115_s21 = sadd.s32 1, %s2217_s14 }
   0x6   : > { %p30_p0 = scmp.ge.s32.totalorder %s28_s20, 2  ;;  %p125_p1 = scmp.ne.s32.totalorder %s2217_s14, %s2213_s13 }
   0x7   : > { %p126_p2 = scmp.eq.s32.totalorder %s1731_s18, 1  ;;  %p131_p3 = scmp.ne.s32.totalorder %s2213_s13, %s2209_s12 }
   0x8   : > { %s3759_s20 = smov (%p30_p0, %s28_s20), 0  ;;  %p132_p5 = scmp.eq.s32.totalorder %s1732_s19, 1 }
   0x9   : > { %p2294_p4 = por %p126_p2, %p125_p1  ;;  %s110_s23 = ssub.s32 %s2225_s16, %s3759_s20 }
   0xa   : > { %p1736_p6 = scmp.ge.s32.totalorder %s2229_s17, 1  ;;  %p113_p7 = scmp.eq.s32.totalorder %s110_s23, 0 }
   0xb   : > { %p2301_p8 = por %p132_p5, %p131_p3  ;;  %p174_p9 = scmp.lt.s32.totalorder %s2229_s17, 3 }
   0xc   : > { %s2307_s25 = scalar_select %p113_p7, %s2217_s14, %s115_s21  }
   0xd   : > { %p175_p10 = pnand %p1736_p6, %p174_p9 }
   0xf   : > { %178 = sbr.rel (%p175_p10) target bundleno = 733 (0x2dd), region = 32 }
  0x16   : > { %v224_v0 = vld [vmem:[%s3566_s2 + $0x8] sm:$0xff]  ;;  %v223_v1 = vld [vmem:[%s3566_s2] sm:$0xff]  ;;  %p207_p11 = scmp.lt.s32.totalorder %s2221_s15, 1  ;;  %v3594_v2 = vmov 0.0   ;;  %vm242_vm0 = vcmask 64512   ;;  %s204_s18 = sand.u32 1, %s2213_s13  }
  0x17   : > { %291 = vmatprep.subr.mxu0 %v224_v0  ;;  %355 = vmatprep.mubr.f32.mxu0 %v3594_v2  ;;  %s1737_s19 = sshll.u32 %s204_s18, 3  ;;  %s1891_s21 = sshll.u32 %s2221_s15, 7 }
  0x18   : > { %292 = vmatpush1.msra.mxu0 %v223_v1  ;;  %s2318_s30 = scalar_select %p207_p11, %s2221_s15, 1  ;;  %1217 = vmatprep.mubr.f32.mxu1 %v3594_v2 }
  0x19   : > { %s206_s23 = scalar_lea.vmem [#allocation2], %s1737_s19  ;;  %s3517_s29 = scalar_lea.hbm %s3567_s3, %s1891_s21 }
  0x1a   : > { %s1890_s4 = sshll.u32 %s2318_s30, 7  ;;  %s1738_s8 = sshll.u32 %s2318_s30, 2 }
  0x1b   : > { %s2325_s7 = scalar_lea.vmem %s3565_s1, %s1890_s4  ;;  %s210_s11 = scalar_lea.vmem %s3564_s0, %s1738_s8 }
  0x1c   : > { %v225_v3 = vld [vmem:[%s2325_s7] sm:$0xff]  ;;  %v226_v4 = vld [vmem:[%s2325_s7 + $0x8] sm:$0xff]  ;;  %v227_v5 = vld [vmem:[%s2325_s7 + $0x10] sm:$0xff]  ;;  %s1634_s26 = sshll.u32 %s206_s23, 4  ;;  %s1618_s30 = scalar_lea.sflag [#allocation3], %s204_s18  ;;  %s3519_s26 = int_to_ptr.vmem [resolvable:$true] %s1634_s26 }
  0x1d   : > { %1741 = vmatmul.mubr.msk.f32.vlgmr.msra.gmra.mrb[0].mxu0 %vm242_vm0, %v225_v3  ;;  %v228_v6 = vld [vmem:[%s2325_s7 + $0x18] sm:$0xff]  ;;  %v229_v7 = vld [vmem:[%s2325_s7 + $0x20] sm:$0xff]  ;;  %v230_v8 = vld [vmem:[%s2325_s7 + $0x28] sm:$0xff]  ;;  %s2151_s15 = scalar_lea.vmem %s3519_s26, 128  ;;  %s2233_s4 = smov [#allocation2]  }
  0x1e   : > { %361 = vmatprep.mubr.f32.mxu0 %v3594_v2  ;;  %v231_v9 = vld [vmem:[%s2325_s7 + $0x30] sm:$0xff]  ;;  %v232_v10 = vld [vmem:[%s2325_s7 + $0x38] sm:$0xff]  ;;  %v233_v11 = vld [vmem:[%s2325_s7 + $0x40] sm:$0xff]  ;;  %p2152_p12 = scmp.ne.s32.totalorder %s3519_s26, %s2151_s15  ;;  %s2155_s5 = sshll.u32 %s2233_s4, 4  ;;  %s2156_s5 = int_to_ptr.vmem [resolvable:$false] %s2155_s5 }
  0x1f   : > { %v234_v12 = vld [vmem:[%s2325_s7 + $0x48] sm:$0xff]  ;;  %v235_v13 = vld [vmem:[%s2325_s7 + $0x50] sm:$0xff]  ;;  %v236_v14 = vld [vmem:[%s2325_s7 + $0x58] sm:$0xff]  ;;  %s2157_s6 = scalar_lea.vmem %s2156_s5, 256  ;;  %p2158_p1 = scmp.lt.s32.totalorder %s3519_s26, %s2156_s5 }
  0x20   : > { %v237_v15 = vld [vmem:[%s2325_s7 + $0x60] sm:$0xff]  ;;  %v238_v16 = vld [vmem:[%s2325_s7 + $0x68] sm:$0xff]  ;;  %v239_v17 = vld [vmem:[%s2325_s7 + $0x70] sm:$0xff]  ;;  %p2153_p13 = pnand %p2152_p12, %p2294_p4  ;;  %p2159_p2 = scmp.lt.s32.totalorder %s2157_s6, %s2151_s15 }
  0x21   : > { %1742 = vmatmul.mubr.msk.f32.gmra.mrb[2].mxu0 %vm242_vm0, %v226_v4  ;;  %v240_v18 = vld [vmem:[%s2325_s7 + $0x78] sm:$0xff] }
  0x22   : > { %367 = vmatprep.mubr.f32.mxu0 %v3594_v2  ;;  %p2154_p0 = pneg %p2153_p13  ;;  %p2160_p3 = por %p2159_p2, %p2158_p1 }
  0x24   : > { %p2161_p5 = pnand %p2160_p3, %p2154_p0 }
  0x25   : > { %1743 = vmatmul.mubr.msk.f32.gmra.mrb[4].mxu0 %vm242_vm0, %v227_v5 }
  0x26   : > { %373 = vmatprep.mubr.f32.mxu0 %v3594_v2 }
  0x29   : > { %1744 = vmatmul.mubr.msk.f32.gmra.mrb[6].mxu0 %vm242_vm0, %v228_v6 }
  0x2a   : > { %379 = vmatprep.mubr.f32.mxu0 %v3594_v2 }
  0x2d   : > { %1745 = vmatmul.mubr.msk.f32.gmra.mrb[8].mxu0 %vm242_vm0, %v229_v7 }
  0x2e   : > { %385 = vmatprep.mubr.f32.mxu0 %v3594_v2 }
  0x31   : > { %1746 = vmatmul.mubr.msk.f32.gmra.mrb[10].mxu0 %vm242_vm0, %v230_v8 }
  0x32   : > { %391 = vmatprep.mubr.f32.mxu0 %v3594_v2 }
  0x35   : > { %1747 = vmatmul.mubr.msk.f32.gmra.mrb[12].mxu0 %vm242_vm0, %v231_v9 }
  0x36   : > { %397 = vmatprep.mubr.f32.mxu0 %v3594_v2 }
  0x39   : > { %1748 = vmatmul.mubr.msk.f32.gmra.mrb[14].mxu0 %vm242_vm0, %v232_v10 }
  0x3a   : > { %403 = vmatprep.mubr.f32.mxu0 %v3594_v2 }
  0x3d   : > { %1749 = vmatmul.mubr.msk.f32.gmra.mrb[16].mxu0 %vm242_vm0, %v233_v11 }
  0x3e   : > { %409 = vmatprep.mubr.f32.mxu0 %v3594_v2 }
  0x41   : > { %1750 = vmatmul.mubr.msk.f32.gmra.mrb[18].mxu0 %vm242_vm0, %v234_v12 }
  0x42   : > { %415 = vmatprep.mubr.f32.mxu0 %v3594_v2 }
  0x45   : > { %1751 = vmatmul.mubr.msk.f32.gmra.mrb[20].mxu0 %vm242_vm0, %v235_v13 }
  0x46   : > { %421 = vmatprep.mubr.f32.mxu0 %v3594_v2 }
  0x49   : > { %1752 = vmatmul.mubr.msk.f32.gmra.mrb[22].mxu0 %vm242_vm0, %v236_v14 }
  0x4a   : > { %427 = vmatprep.mubr.f32.mxu0 %v3594_v2 }
  0x4d   : > { %1753 = vmatmul.mubr.msk.f32.gmra.mrb[24].mxu0 %vm242_vm0, %v237_v15 }
  0x4e   : > { %433 = vmatprep.mubr.f32.mxu0 %v3594_v2 }
  0x51   : > { %1754 = vmatmul.mubr.msk.f32.gmra.mrb[26].mxu0 %vm242_vm0, %v238_v16 }
  0x52   : > { %439 = vmatprep.mubr.f32.mxu0 %v3594_v2 }
  0x55   : > { %1755 = vmatmul.mubr.msk.f32.gmra.mrb[28].mxu0 %vm242_vm0, %v239_v17 }
  0x56   : > { %445 = vmatprep.mubr.f32.mxu0 %v3594_v2 }
  0x59   : > { %1756 = vmatmul.mubr.msk.f32.gmra.mrb[30].mxu0 %vm242_vm0, %v240_v18  ;;  %v452_v18 = vlaneseq }
  0x5a   : > { %845 = vmatprep.mubr.f32.mxu0 %v3594_v2 }
  0xf0   : > { %v2375_v19 = vpop.f32.mrb[0].mxu0 }
  0xf1   : > { %v2377_v20 = vpop.f32.mrb[1].mxu0 }
  0xf4   : > { %v2379_v21 = vpop.f32.mrb[2].mxu0 }
  0xf5   : > { %v2381_v22 = vpop.f32.mrb[3].mxu0 }
  0xf8   : > { %v2383_v23 = vpop.f32.mrb[4].mxu0 }
  0xf9   : > { %v469_v24 = vmin.f32 %v2375_v19, %v2383_v23  ;;  %v2387_v25 = vpop.f32.mrb[5].mxu0 }
  0xfa   : > { %v490_v26 = vmin.f32 %v2377_v20, %v2387_v25 }
  0xfc   : > { %v2391_v27 = vpop.f32.mrb[6].mxu0 }
  0xfd   : > { %v470_v28 = vmin.f32 %v2379_v21, %v2391_v27  ;;  %v2395_v29 = vpop.f32.mrb[7].mxu0 }
  0xfe   : > { %v491_v30 = vmin.f32 %v2381_v22, %v2395_v29 }
 0x100   : > { %v2399_v31 = vpop.f32.mrb[8].mxu0 }
 0x101   : > { %v471_v32 = vmin.f32 %v469_v24, %v2399_v31  ;;  %v2402_v33 = vpop.f32.mrb[9].mxu0 }
 0x102   : > { %v492_v34 = vmin.f32 %v490_v26, %v2402_v33 }
 0x104   : > { %v2405_v35 = vpop.f32.mrb[10].mxu0 }
 0x105   : > { %v472_v36 = vmin.f32 %v470_v28, %v2405_v35  ;;  %v2408_v37 = vpop.f32.mrb[11].mxu0 }
 0x106   : > { %v493_v38 = vmin.f32 %v491_v30, %v2408_v37 }
 0x108   : > { %v2411_v39 = vpop.f32.mrb[12].mxu0 }
 0x109   : > { %v473_v40 = vmin.f32 %v471_v32, %v2411_v39  ;;  %v2414_v41 = vpop.f32.mrb[13].mxu0  ;;  %v2471_v32 = vshrl.u32 %v452_v18, 7 }
 0x10a   : > { %v494_v42 = vmin.f32 %v492_v34, %v2414_v41 }
 0x10c   : > { %v2417_v43 = vpop.f32.mrb[14].mxu0 }
 0x10d   : > { %v474_v44 = vmin.f32 %v472_v36, %v2417_v43  ;;  %v2420_v45 = vpop.f32.mrb[15].mxu0 }
 0x10e   : > { %v495_v46 = vmin.f32 %v493_v38, %v2420_v45 }
 0x110   : > { %v2423_v47 = vpop.f32.mrb[16].mxu0 }
 0x111   : > { %v475_v48 = vmin.f32 %v473_v40, %v2423_v47  ;;  %v2426_v49 = vpop.f32.mrb[17].mxu0 }
 0x112   : > { %v496_v50 = vmin.f32 %v494_v42, %v2426_v49  ;;  %v2474_v42 = vadd.s32 8, %v2471_v32 }
 0x114   : > { %v2429_v51 = vpop.f32.mrb[18].mxu0 }
 0x115   : > { %v476_v52 = vmin.f32 %v474_v44, %v2429_v51  ;;  %v2432_v53 = vpop.f32.mrb[19].mxu0  ;;  %v2477_v44 = vadd.s32 16, %v2471_v32 }
 0x116   : > { %v497_v54 = vmin.f32 %v495_v46, %v2432_v53 }
 0x118   : > { %v2435_v55 = vpop.f32.mrb[20].mxu0 }
 0x119   : > { %v477_v56 = vmin.f32 %v475_v48, %v2435_v55  ;;  %v2438_v57 = vpop.f32.mrb[21].mxu0  ;;  %v2480_v48 = vadd.s32 24, %v2471_v32 }
 0x11a   : > { %v498_v58 = vmin.f32 %v496_v50, %v2438_v57  ;;  %v2483_v50 = vadd.s32 32, %v2471_v32 }
 0x11c   : > { %v2441_v59 = vpop.f32.mrb[22].mxu0 }
 0x11d   : > { %v478_v60 = vmin.f32 %v476_v52, %v2441_v59  ;;  %v2444_v61 = vpop.f32.mrb[23].mxu0  ;;  %v2486_v52 = vadd.s32 40, %v2471_v32 }
 0x11e   : > { %v499_v62 = vmin.f32 %v497_v54, %v2444_v61  ;;  %v2489_v54 = vadd.s32 48, %v2471_v32 }
 0x120   : > { %v2447_v63 = vpop.f32.mrb[24].mxu0 }
 0x121   : > { %v479_v0 = vmin.f32 %v477_v56, %v2447_v63  ;;  %v2450_v1 = vpop.f32.mrb[25].mxu0  ;;  %v2492_v56 = vadd.s32 56, %v2471_v32 }
 0x122   : > { %v500_v3 = vmin.f32 %v498_v58, %v2450_v1  ;;  %v2495_v58 = vadd.s32 64, %v2471_v32 }
 0x124   : > { %v2453_v4 = vpop.f32.mrb[26].mxu0 }
 0x125   : > { %v480_v5 = vmin.f32 %v478_v60, %v2453_v4  ;;  %v2456_v6 = vpop.f32.mrb[27].mxu0  ;;  %v2498_v60 = vadd.s32 72, %v2471_v32 }
 0x126   : > { %v501_v7 = vmin.f32 %v499_v62, %v2456_v6 }
 0x128   : > { %v2459_v8 = vpop.f32.mrb[28].mxu0 }
 0x129   : > { %v481_v9 = vmin.f32 %v479_v0, %v2459_v8  ;;  %v2462_v10 = vpop.f32.mrb[29].mxu0  ;;  %v2503_v0 = vadd.s32 80, %v2471_v32 }
 0x12a   : > { %v502_v11 = vmin.f32 %v500_v3, %v2462_v10  ;;  %v2506_v3 = vadd.s32 88, %v2471_v32 }
 0x12c   : > { %v2465_v12 = vpop.f32.mrb[30].mxu0 }
 0x12d   : > { %v482_v13 = vmin.f32 %v480_v5, %v2465_v12  ;;  %v2468_v14 = vpop.f32.mrb[31].mxu0  ;;  %v2509_v5 = vadd.s32 96, %v2471_v32 }
 0x12e   : > { %v503_v15 = vmin.f32 %v501_v7, %v2468_v14 }
 0x12f   : > { %v483_v16 = vmin.f32 %v481_v9, %v482_v13  ;;  %v2544_v9 = vadd.s32 104, %v2471_v32  ;;  %v2550_v13 = vadd.s32 120, %v2471_v32 }
 0x130   : > { %v504_v17 = vmin.f32 %v502_v11, %v503_v15  ;;  %v2547_v11 = vadd.s32 112, %v2471_v32 }
 0x131   : > { %v484_v24 = vrot.slane %v483_v16, 4 }
 0x132   : > { %v505_v26 = vrot.slane %v504_v17, 4 }
 0x133   : > { %v485_v28 = vmin.f32 %v483_v16, %v484_v24 }
 0x134   : > { %v506_v30 = vmin.f32 %v504_v17, %v505_v26 }
 0x135   : > { %v486_v34 = vrot.slane %v485_v28, 2 }
 0x136   : > { %v507_v36 = vrot.slane %v506_v30, 2 }
 0x137   : > { %v487_v38 = vmin.f32 %v485_v28, %v486_v34 }
 0x138   : > { %v508_v40 = vmin.f32 %v506_v30, %v507_v36 }
 0x139   : > { %v488_v46 = vrot.slane %v487_v38, 1 }
 0x13a   : > { %v509_v7 = vrot.slane %v508_v40, 1 }
 0x13b   : > { %v2500_v62 = vmin.f32 %v487_v38, %v488_v46 }
 0x13c   : > { %v2552_v15 = vmin.f32 %v508_v40, %v509_v7 }
 0x13d   : > { %3625 = vst [vmem:[#allocation5_spill] sm:$0xff] %v2500_v62  ;;  %vm511_vm1 = vcmp.eq.f32.partialorder %v2375_v19, %v2500_v62  ;;  %vm513_vm2 = vcmp.eq.f32.partialorder %v2379_v21, %v2500_v62  ;;  %vm515_vm3 = vcmp.eq.f32.partialorder %v2383_v23, %v2500_v62  ;;  %vm517_vm4 = vcmp.eq.f32.partialorder %v2391_v27, %v2500_v62 }
 0x13e   : > { %vm519_vm5 = vcmp.eq.f32.partialorder %v2399_v31, %v2500_v62  ;;  %vm521_vm6 = vcmp.eq.f32.partialorder %v2405_v35, %v2500_v62  ;;  %vm523_vm7 = vcmp.eq.f32.partialorder %v2411_v39, %v2500_v62  ;;  %vm525_vm8 = vcmp.eq.f32.partialorder %v2417_v43, %v2500_v62  ;;  %3626 = vst [vmem:[#allocation6_spill] sm:$0xff] %v2552_v15 }
 0x13f   : > { %vm527_vm9 = vcmp.eq.f32.partialorder %v2423_v47, %v2500_v62  ;;  %vm529_vm10 = vcmp.eq.f32.partialorder %v2429_v51, %v2500_v62  ;;  %vm531_vm11 = vcmp.eq.f32.partialorder %v2435_v55, %v2500_v62  ;;  %vm533_vm12 = vcmp.eq.f32.partialorder %v2441_v59, %v2500_v62 }
 0x140   : > { %vm535_vm13 = vcmp.eq.f32.partialorder %v2447_v63, %v2500_v62  ;;  %vm537_vm14 = vcmp.eq.f32.partialorder %v2453_v4, %v2500_v62  ;;  %vm539_vm15 = vcmp.eq.f32.partialorder %v2459_v8, %v2500_v62  ;;  %vm541_vm0 = vcmp.eq.f32.partialorder %v2465_v12, %v2500_v62 }
 0x141   : > { %v543_v16 = vsel %vm511_vm1, %v2471_v32, 128  ;;  %v545_v17 = vsel %vm513_vm2, %v2474_v42, 128  ;;  %v547_v18 = vsel %vm515_vm3, %v2477_v44, 128  ;;  %v549_v24 = vsel %vm517_vm4, %v2480_v48, 128 }
 0x142   : > { %v551_v19 = vsel %vm519_vm5, %v2483_v50, 128  ;;  %v553_v21 = vsel %vm521_vm6, %v2486_v52, 128  ;;  %v555_v23 = vsel %vm523_vm7, %v2489_v54, 128  ;;  %v557_v27 = vsel %vm525_vm8, %v2492_v56, 128 }
 0x143   : > { %v559_v31 = vsel %vm527_vm9, %v2495_v58, 128  ;;  %v561_v35 = vsel %vm529_vm10, %v2498_v60, 128  ;;  %v563_v39 = vsel %vm531_vm11, %v2503_v0, 128  ;;  %v565_v43 = vsel %vm533_vm12, %v2506_v3, 128 }
 0x144   : > { %vm575_vm1 = vcmp.lt.s32.totalorder %v543_v16, %v547_v18  ;;  %vm577_vm2 = vcmp.lt.s32.totalorder %v545_v17, %v549_v24  ;;  %vm512_vm3 = vcmp.eq.f32.partialorder %v2377_v20, %v2552_v15  ;;  %vm514_vm4 = vcmp.eq.f32.partialorder %v2381_v22, %v2552_v15 }
 0x145   : > { %v576_v47 = vsel %vm575_vm1, %v543_v16, %v547_v18  ;;  %v578_v51 = vsel %vm577_vm2, %v545_v17, %v549_v24  ;;  %vm528_vm6 = vcmp.eq.f32.partialorder %v2426_v49, %v2552_v15  ;;  %vm536_vm12 = vcmp.eq.f32.partialorder %v2450_v1, %v2552_v15 }
 0x146   : > { %vm579_vm7 = vcmp.lt.s32.totalorder %v576_v47, %v551_v19  ;;  %vm581_vm8 = vcmp.lt.s32.totalorder %v578_v51, %v553_v21  ;;  %vm538_vm9 = vcmp.eq.f32.partialorder %v2456_v6, %v2552_v15  ;;  %v567_v36 = vsel %vm535_vm13, %v2509_v5, 128 }
 0x147   : > { %v580_v55 = vsel %vm579_vm7, %v576_v47, %v551_v19  ;;  %v582_v59 = vsel %vm581_vm8, %v578_v51, %v553_v21  ;;  %vm534_vm8 = vcmp.eq.f32.partialorder %v2444_v61, %v2552_v15  ;;  %v569_v38 = vsel %vm537_vm14, %v2544_v9, 128 }
 0x148   : > { %vm583_vm1 = vcmp.lt.s32.totalorder %v580_v55, %v555_v23  ;;  %vm585_vm2 = vcmp.lt.s32.totalorder %v582_v59, %v557_v27  ;;  %v571_v7 = vsel %vm539_vm15, %v2547_v11, 128  ;;  %v573_v16 = vsel %vm541_vm0, %v2550_v13, 128 }
 0x149   : > { %v584_v26 = vsel %vm583_vm1, %v580_v55, %v555_v23  ;;  %v586_v28 = vsel %vm585_vm2, %v582_v59, %v557_v27  ;;  %vm540_vm1 = vcmp.eq.f32.partialorder %v2462_v10, %v2552_v15  ;;  %vm542_vm2 = vcmp.eq.f32.partialorder %v2468_v14, %v2552_v15 }
 0x14a   : > { %vm587_vm11 = vcmp.lt.s32.totalorder %v584_v26, %v559_v31  ;;  %vm589_vm10 = vcmp.lt.s32.totalorder %v586_v28, %v561_v35  ;;  %v544_v4 = vsel %vm512_vm3, %v2471_v32, 128  ;;  %v546_v8 = vsel %vm514_vm4, %v2474_v42, 128 }
 0x14b   : > { %v588_v30 = vsel %vm587_vm11, %v584_v26, %v559_v31  ;;  %v590_v34 = vsel %vm589_vm10, %v586_v28, %v561_v35  ;;  %vm3627_vm15 = vcmp.eq.f32.partialorder %v2387_v25, %v2552_v15  ;;  %vm3628_vm0 = vcmp.eq.f32.partialorder %v2395_v29, %v2552_v15 }
 0x14c   : > { %vm591_vm7 = vcmp.lt.s32.totalorder %v588_v30, %v563_v39  ;;  %vm593_vm5 = vcmp.lt.s32.totalorder %v590_v34, %v565_v43  ;;  %v548_v12 = vsel %vm3627_vm15, %v2477_v44, 128  ;;  %v550_v18 = vsel %vm3628_vm0, %v2480_v48, 128 }
 0x14d   : > { %v592_v40 = vsel %vm591_vm7, %v588_v30, %v563_v39  ;;  %v594_v46 = vsel %vm593_vm5, %v590_v34, %v565_v43  ;;  %vm3629_vm4 = vcmp.eq.f32.partialorder %v2402_v33, %v2552_v15  ;;  %vm614_vm5 = vcmp.lt.s32.totalorder %v544_v4, %v548_v12 }
 0x14e   : > { %vm595_vm10 = vcmp.lt.s32.totalorder %v592_v40, %v567_v36  ;;  %vm597_vm11 = vcmp.lt.s32.totalorder %v594_v46, %v569_v38  ;;  %v552_v22 = vsel %vm3629_vm4, %v2483_v50, 128  ;;  %vm616_vm7 = vcmp.lt.s32.totalorder %v546_v8, %v550_v18 }
 0x14f   : > { %v596_v63 = vsel %vm595_vm10, %v592_v40, %v567_v36  ;;  %v598_v17 = vsel %vm597_vm11, %v594_v46, %v569_v38  ;;  %vm3630_vm10 = vcmp.eq.f32.partialorder %v2408_v37, %v2552_v15  ;;  %v615_v23 = vsel %vm614_vm5, %v544_v4, %v548_v12  ;;  %v241_v46 = vld [vmem:[%s210_s11] sm:$0xf] }
 0x150   : > { %vm599_vm13 = vcmp.lt.s32.totalorder %v596_v63, %v571_v7  ;;  %vm601_vm14 = vcmp.lt.s32.totalorder %v598_v17, %v573_v16  ;;  %v554_v25 = vsel %vm3630_vm10, %v2486_v52, 128  ;;  %v617_v29 = vsel %vm616_vm7, %v546_v8, %v550_v18 }
 0x151   : > { %v600_v24 = vsel %vm599_vm13, %v596_v63, %v571_v7  ;;  %v602_v20 = vsel %vm601_vm14, %v598_v17, %v573_v16  ;;  %vm3631_vm11 = vcmp.eq.f32.partialorder %v2414_v41, %v2552_v15  ;;  %vm618_vm13 = vcmp.lt.s32.totalorder %v615_v23, %v552_v22 }
 0x152   : > { %vm603_vm3 = vcmp.lt.s32.totalorder %v600_v24, %v602_v20  ;;  %v556_v27 = vsel %vm3631_vm11, %v2489_v54, 128  ;;  %vm620_vm14 = vcmp.lt.s32.totalorder %v617_v29, %v554_v25  ;;  %vm3632_vm0 = vcmp.eq.f32.partialorder %v2420_v45, %v2552_v15 }
 0x153   : > { %v604_v19 = vsel %vm603_vm3, %v600_v24, %v602_v20  ;;  %v558_v33 = vsel %vm3632_vm0, %v2492_v56, 128  ;;  %v619_v31 = vsel %vm618_vm13, %v615_v23, %v552_v22  ;;  %v621_v35 = vsel %vm620_vm14, %v617_v29, %v554_v25 }
 0x154   : > { %v605_v21 = vrot.slane %v604_v19, 4  ;;  %v560_v37 = vsel %vm528_vm6, %v2495_v58, 128  ;;  %vm622_vm3 = vcmp.lt.s32.totalorder %v619_v31, %v556_v27  ;;  %vm624_vm4 = vcmp.lt.s32.totalorder %v621_v35, %v558_v33 }
 0x155   : > { %vm3633_vm5 = vcmp.eq.f32.partialorder %v2432_v53, %v2552_v15  ;;  %v623_v47 = vsel %vm622_vm3, %v619_v31, %v556_v27  ;;  %v625_v45 = vsel %vm624_vm4, %v621_v35, %v558_v33  ;;  %vm3634_vm7 = vcmp.eq.f32.partialorder %v2438_v57, %v2552_v15 }
 0x156   : > { %vm606_vm15 = vcmp.lt.s32.totalorder %v604_v19, %v605_v21  ;;  %v562_v43 = vsel %vm3633_vm5, %v2498_v60, 128  ;;  %v564_v51 = vsel %vm3634_vm7, %v2503_v0, 128  ;;  %vm626_vm10 = vcmp.lt.s32.totalorder %v623_v47, %v560_v37 }
 0x157   : > { %v607_v39 = vsel %vm606_vm15, %v604_v19, %v605_v21  ;;  %vm628_vm11 = vcmp.lt.s32.totalorder %v625_v45, %v562_v43  ;;  %v566_v49 = vsel %vm534_vm8, %v2506_v3, 128  ;;  %v627_v55 = vsel %vm626_vm10, %v623_v47, %v560_v37 }
 0x158   : > { %v608_v41 = vrot.slane %v607_v39, 2  ;;  %v629_v59 = vsel %vm628_vm11, %v625_v45, %v562_v43  ;;  %v568_v53 = vsel %vm536_vm12, %v2509_v5, 128  ;;  %vm630_vm6 = vcmp.lt.s32.totalorder %v627_v55, %v564_v51 }
 0x159   : > { %vm632_vm14 = vcmp.lt.s32.totalorder %v629_v59, %v566_v49  ;;  %v570_v28 = vsel %vm538_vm9, %v2544_v9, 128  ;;  %v631_v30 = vsel %vm630_vm6, %v627_v55, %v564_v51  ;;  %v572_v34 = vsel %vm540_vm1, %v2547_v11, 128 }
 0x15a   : > { %vm609_vm13 = vcmp.lt.s32.totalorder %v607_v39, %v608_v41  ;;  %v633_v61 = vsel %vm632_vm14, %v629_v59, %v566_v49  ;;  %vm634_vm8 = vcmp.lt.s32.totalorder %v631_v30, %v568_v53  ;;  %v574_v1 = vsel %vm542_vm2, %v2550_v13, 128 }
 0x15b   : > { %v610_v26 = vsel %vm609_vm13, %v607_v39, %v608_v41  ;;  %vm636_vm15 = vcmp.lt.s32.totalorder %v633_v61, %v570_v28  ;;  %v635_v36 = vsel %vm634_vm8, %v631_v30, %v568_v53  ;;  %v2724_v14 = vand.u32 4294901760, %v241_v46 }
 0x15c   : > { %v611_v57 = vrot.slane %v610_v26, 1  ;;  %v637_v38 = vsel %vm636_vm15, %v633_v61, %v570_v28  ;;  %vm638_vm9 = vcmp.lt.s32.totalorder %v635_v36, %v572_v34  ;;  %v3584_v51 = vmov 1.0|1.0  }
 0x15d   : > { %vm640_vm12 = vcmp.lt.s32.totalorder %v637_v38, %v574_v1  ;;  %v639_v6 = vsel %vm638_vm9, %v635_v36, %v572_v34  ;;  %3635 = vst [vmem:[#allocation7_spill] sm:$0xff] %v2724_v14  ;;  %v2741_v12 = vsub.f32 %v241_v46, %v2724_v14  ;;  %v3689_v14 = vmov 1.0|1.0  }
 0x15e   : > { %vm612_vm0 = vcmp.lt.s32.totalorder %v610_v26, %v611_v57  ;;  %v641_v40 = vsel %vm640_vm12, %v637_v38, %v574_v1 }
 0x15f   : > { %v2718_v10 = vsel %vm612_vm0, %v610_v26, %v611_v57  ;;  %vm642_vm1 = vcmp.lt.s32.totalorder %v639_v6, %v641_v40  ;;  %v3574_v29 = vand.u32 4294901760, %v2741_v12 }
 0x160   : > { %v643_v7 = vsel %vm642_vm1, %v639_v6, %v641_v40  ;;  %vm653_vm3 = vcmp.eq.s32.totalorder %v2471_v32, %v2718_v10  ;;  %vm655_vm2 = vcmp.eq.s32.totalorder %v2474_v42, %v2718_v10  ;;  %vm657_vm5 = vcmp.eq.s32.totalorder %v2477_v44, %v2718_v10 }
 0x161   : > { %v644_v16 = vrot.slane %v643_v7, 4  ;;  %vm659_vm7 = vcmp.eq.s32.totalorder %v2480_v48, %v2718_v10  ;;  %v1757_v4 = vsel %vm653_vm3, 1.0, %v3594_v2  ;;  %v1759_v8 = vsel %vm655_vm2, 1.0, %v3594_v2 }
 0x162   : > { %vm661_vm10 = vcmp.eq.s32.totalorder %v2483_v50, %v2718_v10  ;;  %v1761_v18 = vsel %vm657_vm5, 1.0, %v3594_v2  ;;  %v1763_v24 = vsel %vm659_vm7, 1.0, %v3594_v2  ;;  %v2751_v19 = vsub.f32 %v1757_v4, %v1757_v4 }
 0x163   : > { %vm645_vm4 = vcmp.lt.s32.totalorder %v643_v7, %v644_v16  ;;  %v2753_v22 = vsub.f32 %v1759_v8, %v1759_v8  ;;  %vm663_vm13 = vcmp.eq.s32.totalorder %v2486_v52, %v2718_v10  ;;  %v1765_v25 = vsel %vm661_vm10, 1.0, %v3594_v2 }
 0x164   : > { %v646_v63 = vsel %vm645_vm4, %v643_v7, %v644_v16  ;;  %3636 = vst [vmem:[#allocation8_spill] sm:$0xff] %v2751_v19  ;;  %v2761_v23 = vsub.f32 %v1761_v18, %v1761_v18  ;;  %v2764_v27 = vsub.f32 %v1763_v24, %v1763_v24  ;;  %v1767_v33 = vsel %vm663_vm13, 1.0, %v3594_v2  ;;  %vm2808_vm4 = vmpackc.low %vm655_vm2, %vm653_vm3 }
 0x165   : > { %v647_v17 = vrot.slane %v646_v63, 2  ;;  %3637 = vst [vmem:[#allocation9_spill] sm:$0xff] %v2753_v22  ;;  %vm665_vm14 = vcmp.eq.s32.totalorder %v2489_v54, %v2718_v10  ;;  %v1958_v35 = vpack.c.bf16 %v2753_v22, %v2751_v19  ;;  %v2776_v39 = vsub.f32 %v1765_v25, %v1765_v25 }
 0x166   : > { %3638 = vst [vmem:[#allocation10_spill] sm:$0xff] %v2761_v23  ;;  %3639 = vst [vmem:[#allocation11_spill] sm:$0xff] %v2764_v27  ;;  %vm667_vm8 = vcmp.eq.s32.totalorder %v2492_v56, %v2718_v10  ;;  %v2853_v30 = vsub.f32 %v1767_v33, %v1767_v33  ;;  %v1769_v61 = vsel %vm665_vm14, 1.0, %v3594_v2  ;;  %v2911_v16 = vsub.f32 %v2741_v12, %v3574_v29 }
 0x167   : > { %vm648_vm11 = vcmp.lt.s32.totalorder %v646_v63, %v647_v17  ;;  %3640 = vst [vmem:[#allocation12_spill] sm:$0xff] %v2776_v39  ;;  %v1771_v34 = vsel %vm667_vm8, 1.0, %v3594_v2  ;;  %v3688_v15 = vand.u32 4294901760, %v2753_v22 }
 0x168   : > { %v649_v20 = vsel %vm648_vm11, %v646_v63, %v647_v17  ;;  %v2916_v63 = vsub.f32 %v1769_v61, %v1769_v61  ;;  %v2926_v4 = vsub.f32 %v1771_v34, %v1771_v34  ;;  %v1966_v8 = vpack.c.bf16 %v2853_v30, %v2776_v39 }
 0x169   : > { %v650_v21 = vrot.slane %v649_v20, 1  ;;  %v878_v62 = vsub.f32 %v2753_v22, %v3688_v15 }
 0x16b   : > { %vm651_vm6 = vcmp.lt.s32.totalorder %v649_v20, %v650_v21 }
 0x16c   : > { %v2772_v31 = vsel %vm651_vm6, %v649_v20, %v650_v21 }
 0x16d   : > { %vm654_vm15 = vcmp.eq.s32.totalorder %v2471_v32, %v2772_v31  ;;  %vm656_vm0 = vcmp.eq.s32.totalorder %v2474_v42, %v2772_v31  ;;  %vm658_vm9 = vcmp.eq.s32.totalorder %v2477_v44, %v2772_v31  ;;  %vm660_vm12 = vcmp.eq.s32.totalorder %v2480_v48, %v2772_v31  ;;  %v3751_v44 = vld [vmem:[#allocation5_spill] sm:$0xff] }
 0x16e   : > { %vm2788_vm1 = vmpackc.low %vm656_vm0, %vm654_vm15  ;;  %v1762_v41 = vsel %vm658_vm9, 1.0, %v3594_v2  ;;  %v1764_v43 = vsel %vm660_vm12, 1.0, %v3594_v2  ;;  %v1758_v47 = vsel %vm654_vm15, 1.0, %v3594_v2  ;;  %v1760_v45 = vsel %vm656_vm0, 1.0, %v3594_v2 }
 0x16f   : > { %1893 = vmatprep.subr.msk.bf16.mxu0 %vm2788_vm1, %v3584_v51  ;;  %v2812_v55 = vsub.f32 %v1762_v41, %v1762_v41  ;;  %v2814_v59 = vsub.f32 %v1764_v43, %v1764_v43  ;;  %v2816_v26 = vsub.f32 %v1758_v47, %v1758_v47  ;;  %v2818_v53 = vsub.f32 %v1760_v45, %v1760_v45  ;;  %vm2826_vm11 = vmpackc.low %vm660_vm12, %vm658_vm9  ;;  %v3752_v45 = vld [vmem:[#allocation6_spill] sm:$0xff] }
 0x170   : > { %1895 = vmatpush1.bf16.msk.msra.mxu0 %vm2808_vm4, %v3584_v51  ;;  %vm662_vm3 = vcmp.eq.s32.totalorder %v2483_v50, %v2772_v31  ;;  %vm664_vm2 = vcmp.eq.s32.totalorder %v2486_v52, %v2772_v31  ;;  %vm666_vm6 = vcmp.eq.s32.totalorder %v2489_v54, %v2772_v31  ;;  %vm3568_vm15 = vcmp.eq.s32.totalorder %v2495_v58, %v2718_v10  ;;  %vm2871_vm12 = vmpackc.low %vm659_vm7, %vm657_vm5 }
 0x171   : > { %3645 = vst [vmem:[#allocation13_spill] sm:$0xff] %v2816_v26  ;;  %3646 = vst [vmem:[#allocation14_spill] sm:$0xff] %v2818_v53  ;;  %1897 = vmatprep.subr.msk.bf16.mxu0 %vm2826_vm11, %v3584_v51  ;;  %v1956_v42 = vpack.c.bf16 %v2818_v53, %v2816_v26  ;;  %v1766_v57 = vsel %vm662_vm3, 1.0, %v3594_v2  ;;  %v1768_v28 = vsel %vm664_vm2, 1.0, %v3594_v2  ;;  %vm668_vm0 = vcmp.eq.s32.totalorder %v2492_v56, %v2772_v31 }
 0x172   : > { %vm3569_vm9 = vcmp.eq.s32.totalorder %v2498_v60, %v2718_v10  ;;  %v2875_v36 = vsub.f32 %v1766_v57, %v1766_v57  ;;  %v2877_v38 = vsub.f32 %v1768_v28, %v1768_v28  ;;  %v1960_v6 = vpack.c.bf16 %v2814_v59, %v2812_v55  ;;  %vm2894_vm5 = vmpackc.low %vm664_vm2, %vm662_vm3 }
 0x173   : > { %1957 = vmatprep.subr.bf16.mxu1 %v1956_v42  ;;  %v1773_v40 = vsel %vm3568_vm15, 1.0, %v3594_v2  ;;  %v1962_v48 = vpack.c.bf16 %v2764_v27, %v2761_v23  ;;  %v1770_v46 = vsel %vm666_vm6, 1.0, %v3594_v2  ;;  %v1772_v7 = vsel %vm668_vm0, 1.0, %v3594_v2  ;;  %vm2940_vm15 = vmpackc.low %vm663_vm13, %vm661_vm10 }
 0x174   : > { %3651 = vst [vmem:[#allocation15_spill] sm:$0xff] %v2875_v36  ;;  %3652 = vst [vmem:[#allocation16_spill] sm:$0xff] %v2877_v38  ;;  %1899 = vmatpush1.bf16.msk.msra.mxu0 %vm2871_vm12, %v3584_v51  ;;  %1959 = vmatpush1.bf16.msra.mxu1 %v1958_v35  ;;  %vm3571_vm7 = vcmp.eq.s32.totalorder %v2495_v58, %v2772_v31  ;;  %vm3570_vm3 = vcmp.eq.s32.totalorder %v2498_v60, %v2772_v31  ;;  %v1775_v17 = vsel %vm3569_vm9, 1.0, %v3594_v2 }
 0x175   : > { %1901 = vmatprep.subr.msk.bf16.mxu0 %vm2894_vm5, %v3584_v51  ;;  %1961 = vmatprep.subr.bf16.mxu1 %v1960_v6  ;;  %v2930_v18 = vsub.f32 %v1773_v40, %v1773_v40  ;;  %vm3573_vm2 = vcmp.eq.s32.totalorder %v2503_v0, %v2718_v10  ;;  %v2944_v20 = vsub.f32 %v1770_v46, %v1770_v46  ;;  %vm2961_vm10 = vmpackc.low %vm668_vm0, %vm666_vm6  ;;  %v1774_v52 = vsel %vm3571_vm7, 1.0, %v3594_v2 }
 0x176   : > { %v2946_v21 = vsub.f32 %v1772_v7, %v1772_v7  ;;  %v1964_v25 = vpack.c.bf16 %v2877_v38, %v2875_v36  ;;  %vm3572_vm9 = vcmp.eq.s32.totalorder %v2506_v3, %v2718_v10  ;;  %v1776_v33 = vsel %vm3570_vm3, 1.0, %v3594_v2  ;;  %vm3005_vm3 = vmpackc.low %vm667_vm8, %vm665_vm14 }
 0x177   : > { %v2973_v35 = vsub.f32 %v1775_v17, %v1775_v17  ;;  %vm674_vm13 = vcmp.eq.s32.totalorder %v2503_v0, %v2772_v31  ;;  %vm3577_vm0 = vcmp.eq.s32.totalorder %v2509_v5, %v2772_v31  ;;  %v1777_v43 = vsel %vm3573_vm2, 1.0, %v3594_v2 }
 0x178   : > { %1903 = vmatpush1.bf16.msk.msra.mxu0 %vm2940_vm15, %v3584_v51  ;;  %1963 = vmatpush1.bf16.msra.mxu1 %v1962_v48  ;;  %v1779_v47 = vsel %vm3572_vm9, 1.0, %v3594_v2  ;;  %vm3576_vm7 = vcmp.eq.s32.totalorder %v2509_v5, %v2718_v10  ;;  %vm3575_vm6 = vcmp.eq.s32.totalorder %v2544_v9, %v2718_v10  ;;  %v3009_v42 = vsub.f32 %v1774_v52, %v1774_v52 }
 0x179   : > { %1905 = vmatprep.subr.msk.bf16.mxu0 %vm2961_vm10, %v3584_v51  ;;  %1965 = vmatprep.subr.bf16.mxu1 %v1964_v25  ;;  %v3011_v57 = vsub.f32 %v1776_v33, %v1776_v33  ;;  %v1968_v28 = vpack.c.bf16 %v2946_v21, %v2944_v20  ;;  %v1778_v61 = vsel %vm674_vm13, 1.0, %v3594_v2  ;;  %vm3661_vm14 = vcmp.eq.s32.totalorder %v2495_v58, %v2772_v31 }
 0x17a   : > { %vm3662_vm8 = vcmp.eq.s32.totalorder %v2498_v60, %v2772_v31  ;;  %v1970_v56 = vpack.c.bf16 %v2926_v4, %v2916_v63  ;;  %vm3665_vm2 = vcmp.eq.s32.totalorder %v2506_v3, %v2772_v31  ;;  %v1782_v6 = vsel %vm3577_vm0, 1.0, %v3594_v2 }
 0x17b   : > { %vm3028_vm9 = vmpackc.low %vm3662_vm8, %vm3661_vm14  ;;  %v1780_v34 = vsel %vm3665_vm2, 1.0, %v3594_v2  ;;  %vm3666_vm14 = vcmp.eq.s32.totalorder %v2544_v9, %v2772_v31  ;;  %v3049_v48 = vsub.f32 %v1777_v43, %v1777_v43  ;;  %v3051_v46 = vsub.f32 %v1779_v47, %v1779_v47 }
 0x17c   : > { %1907 = vmatpush1.bf16.msk.msra.mxu0 %vm3005_vm3, %v3584_v51  ;;  %1967 = vmatpush1.bf16.msra.mxu1 %v1966_v8  ;;  %v1784_v40 = vsel %vm3666_vm14, 1.0, %v3594_v2  ;;  %v1974_v7 = vpack.c.bf16 %v2973_v35, %v2930_v18  ;;  %v1781_v17 = vsel %vm3576_vm7, 1.0, %v3594_v2  ;;  %v3059_v8 = vsub.f32 %v1778_v61, %v1778_v61 }
 0x17d   : > { %1909 = vmatprep.subr.msk.bf16.mxu0 %vm3028_vm9, %v3584_v51  ;;  %1969 = vmatprep.subr.bf16.mxu1 %v1968_v28  ;;  %v1783_v25 = vsel %vm3575_vm6, 1.0, %v3594_v2  ;;  %v3578_v52 = vand.u32 4294901760, %v2816_v26  ;;  %v3580_v33 = vand.u32 4294901760, %v2818_v53  ;;  %vm3667_vm2 = vcmp.eq.s32.totalorder %v2495_v58, %v2718_v10 }
 0x17e   : > { %vm3668_vm8 = vcmp.eq.s32.totalorder %v2498_v60, %v2718_v10  ;;  %v3077_v47 = vsub.f32 %v1780_v34, %v1780_v34  ;;  %v1972_v28 = vpack.c.bf16 %v3011_v57, %v3009_v42  ;;  %v3081_v61 = vsub.f32 %v1782_v6, %v1782_v6 }
 0x17f   : > { %vm3073_vm14 = vmpackc.low %vm3668_vm8, %vm3667_vm2  ;;  %v3083_v29 = vsub.f32 %v1784_v40, %v1784_v40  ;;  %vm3671_vm2 = vcmp.eq.s32.totalorder %v2506_v3, %v2772_v31  ;;  %v3672_v58 = vmov 0  ;;  %v3099_v60 = vsub.f32 %v1781_v17, %v1781_v17 }
 0x180   : > { %1911 = vmatpush1.bf16.msk.msra.mxu0 %vm3073_vm14, %v3584_v51  ;;  %1971 = vmatpush1.bf16.msra.mxu1 %v1970_v56  ;;  %vm3095_vm8 = vmpackc.low %vm3671_vm2, %vm674_vm13  ;;  %vm3579_vm6 = vcmp.eq.s32.totalorder %v2547_v11, %v2772_v31  ;;  %vm3581_vm7 = vcmp.eq.s32.totalorder %v2550_v13, %v2772_v31  ;;  %v3114_v6 = vsub.f32 %v1783_v25, %v1783_v25  ;;  %v3677_v25 = vmov 0 }
 0x181   : > { %v3673_v58 = vsel %vm3095_vm8, 4294967295, %v3672_v58  ;;  %1913 = vmatprep.subr.msk.bf16.mxu0 %vm3095_vm8, %v3584_v51  ;;  %1973 = vmatprep.subr.bf16.mxu1 %v1972_v28  ;;  %v1978_v40 = vpack.c.bf16 %v3051_v46, %v3049_v48  ;;  %v860_v17 = vsub.f32 %v2816_v26, %v3578_v52  ;;  %v872_v28 = vsub.f32 %v2818_v53, %v3580_v33 }
 0x182   : > { %3674 = vst [vmem:[#allocation17_spill] sm:$0xff] %v3673_v58  ;;  %vm3675_vm2 = vcmp.eq.s32.totalorder %v2503_v0, %v2718_v10  ;;  %vm3676_vm13 = vcmp.eq.s32.totalorder %v2506_v3, %v2718_v10  ;;  %v1976_v34 = vpack.c.bf16 %v3077_v47, %v3059_v8  ;;  %v1786_v52 = vsel %vm3579_vm6, 1.0, %v3594_v2 }
 0x183   : > { %vm3130_vm0 = vmpackc.low %vm3676_vm13, %vm3675_vm2  ;;  %v1788_v0 = vsel %vm3581_vm7, 1.0, %v3594_v2  ;;  %v1980_v3 = vpack.c.bf16 %v3083_v29, %v3081_v61  ;;  %vm3680_vm13 = vcmp.eq.s32.totalorder %v2509_v5, %v2772_v31  ;;  %vm3681_vm2 = vcmp.eq.s32.totalorder %v2544_v9, %v2772_v31 }
 0x184   : > { %v3678_v25 = vsel %vm3130_vm0, 4294967295, %v3677_v25  ;;  %1915 = vmatpush1.bf16.msk.msra.mxu0 %vm3130_vm0, %v3584_v51  ;;  %1975 = vmatpush1.bf16.msra.mxu1 %v1974_v7  ;;  %vm3155_vm6 = vmpackc.low %vm3681_vm2, %vm3680_vm13  ;;  %v3682_v33 = vmov 0  ;;  %vm3685_vm7 = vcmp.eq.s32.totalorder %v2547_v11, %v2718_v10  ;;  %vm3686_vm0 = vcmp.eq.s32.totalorder %v2550_v13, %v2718_v10 }
 0x185   : > { %3679 = vst [vmem:[#allocation18_spill] sm:$0xff] %v3678_v25  ;;  %v3683_v33 = vsel %vm3155_vm6, 4294967295, %v3682_v33  ;;  %v1785_v56 = vsel %vm3685_vm7, 1.0, %v3594_v2  ;;  %v1787_v7 = vsel %vm3686_vm0, 1.0, %v3594_v2  ;;  %v3687_v51 = vand.u32 4294901760, %v2751_v19  ;;  %1917 = vmatprep.subr.msk.bf16.mxu0 %vm3155_vm6, %v3689_v14  ;;  %1977 = vmatprep.subr.bf16.mxu1 %v1976_v34 }
 0x186   : > { %3684 = vst [vmem:[#allocation19_spill] sm:$0xff] %v3683_v33  ;;  %v3690_v53 = vand.u32 4294901760, %v2812_v55  ;;  %v3691_v25 = vand.u32 4294901760, %v2814_v59  ;;  %v3606_v58 = vand.u32 4294901760, %v2761_v23  ;;  %v3186_v15 = vsub.f32 %v1788_v0, %v1788_v0 }
 0x187   : > { %v866_v41 = vsub.f32 %v2751_v19, %v3687_v51  ;;  %v3605_v51 = vand.u32 4294901760, %v2764_v27  ;;  %v3184_v19 = vsub.f32 %v1786_v52, %v1786_v52  ;;  %v861_v22 = vand.u32 4294901760, %v860_v17 }
 0x188   : > { %v884_v26 = vsub.f32 %v2812_v55, %v3690_v53  ;;  %v896_v2 = vsub.f32 %v2814_v59, %v3691_v25  ;;  %v873_v33 = vand.u32 4294901760, %v872_v28  ;;  %vm3692_vm7 = vcmp.eq.s32.totalorder %v2509_v5, %v2718_v10  ;;  %1979 = vmatpush1.bf16.msra.mxu1 %v1978_v40 }
 0x189   : > { %vm3693_vm0 = vcmp.eq.s32.totalorder %v2544_v9, %v2718_v10  ;;  %v3198_v34 = vsub.f32 %v1785_v56, %v1785_v56  ;;  %v3200_v25 = vsub.f32 %v1787_v7, %v1787_v7  ;;  %v3604_v52 = vand.u32 4294901760, %v2875_v36  ;;  %1981 = vmatprep.subr.bf16.mxu1 %v1980_v3 }
 0x18a   : > { %vm3194_vm13 = vmpackc.low %vm3693_vm0, %vm3692_vm7  ;;  %vm3696_vm2 = vcmp.eq.s32.totalorder %v2547_v11, %v2772_v31  ;;  %vm3697_vm7 = vcmp.eq.s32.totalorder %v2550_v13, %v2772_v31  ;;  %v3698_v5 = vmov 0  ;;  %v867_v9 = vand.u32 4294901760, %v866_v41 }
 0x18b   : > { %1919 = vmatpush1.bf16.msk.msra.mxu0 %vm3194_vm13, %v3689_v14  ;;  %vm3213_vm0 = vmpackc.low %vm3697_vm7, %vm3696_vm2  ;;  %v879_v56 = vand.u32 4294901760, %v878_v62  ;;  %v885_v40 = vand.u32 4294901760, %v884_v26  ;;  %v897_v7 = vand.u32 4294901760, %v896_v2  ;;  %v890_v31 = vsub.f32 %v2761_v23, %v3606_v58 }
 0x18c   : > { %v3699_v5 = vsel %vm3213_vm0, 4294967295, %v3698_v5  ;;  %1921 = vmatprep.subr.msk.bf16.mxu0 %vm3213_vm0, %v3689_v14  ;;  %v902_v41 = vsub.f32 %v2764_v27, %v3605_v51  ;;  %v1982_v62 = vpack.c.bf16 %v3114_v6, %v3099_v60  ;;  %v1924_v17 = vpack.c.bf16 %v873_v33, %v861_v22 }
 0x18d   : > { %v1984_v28 = vpack.c.bf16 %v3186_v15, %v3184_v19  ;;  %v850_v0 = vand.u32 4294901760, %v2911_v16  ;;  %vm3700_vm2 = vcmp.eq.s32.totalorder %v2547_v11, %v2718_v10  ;;  %vm3701_vm7 = vcmp.eq.s32.totalorder %v2550_v13, %v2718_v10 }
 0x18e   : > { %vm3239_vm0 = vmpackc.low %vm3701_vm7, %vm3700_vm2  ;;  %v908_v26 = vsub.f32 %v2875_v36, %v3604_v52  ;;  %v3704_v22 = vand.u32 4294901760, %v2877_v38  ;;  %1983 = vmatpush1.bf16.msra.mxu1 %v1982_v62  ;;  %v1986_v11 = vpack.c.bf16 %v3200_v25, %v3198_v34  ;;  %v3705_v13 = vand.u32 4294901760, %v2776_v39 }
 0x18f   : > { %1923 = vmatpush1.bf16.msk.msra.mxu0 %vm3239_vm0, %v3689_v14  ;;  %v3706_v52 = vand.u32 4294901760, %v2853_v30  ;;  %1985 = vmatprep.subr.bf16.mxu1 %v1984_v28  ;;  %v1926_v51 = vpack.c.bf16 %v879_v56, %v867_v9  ;;  %v1928_v58 = vpack.c.bf16 %v897_v7, %v885_v40  ;;  %v891_v3 = vand.u32 4294901760, %v890_v31 }
 0x190   : > { %v920_v33 = vsub.f32 %v2877_v38, %v3704_v22  ;;  %v914_v10 = vsub.f32 %v2776_v39, %v3705_v13  ;;  %1925 = vmatprep.subr.bf16.mxu0 %v1924_v17  ;;  %v903_v16 = vand.u32 4294901760, %v902_v41  ;;  %v937_v38 = vand.u32 4294901760, %v2916_v63 }
 0x191   : > { %v926_v22 = vsub.f32 %v2853_v30, %v3706_v52  ;;  %v949_v62 = vand.u32 4294901760, %v2926_v4  ;;  %v955_v36 = vand.u32 4294901760, %v3009_v42  ;;  %v3614_v27 = vand.u32 4294901760, %v3011_v57 }
 0x192   : > { %851 = vmatmul.mubr.f32.vlgmr.msra.gmra.mrb[32].mxu0 %v850_v0  ;;  %v909_v13 = vand.u32 4294901760, %v908_v26  ;;  %v921_v39 = vand.u32 4294901760, %v920_v33  ;;  %v3707_v23 = vand.u32 4294901760, %v2944_v20  ;;  %v3708_v9 = vand.u32 4294901760, %v2946_v21  ;;  %1987 = vmatpush1.bf16.msra.mxu1 %v1986_v11 }
 0x193   : > { %1927 = vmatpush1.bf16.msra.mxu0 %v1926_v51  ;;  %v915_v17 = vand.u32 4294901760, %v914_v10  ;;  %v927_v28 = vand.u32 4294901760, %v926_v22  ;;  %v3613_v40 = vand.u32 4294901760, %v2930_v18  ;;  %v3612_v7 = vand.u32 4294901760, %v2973_v35  ;;  %1989 = vmatprep.subr.msk.bf16.mxu1 %vm2788_vm1, %v3689_v14 }
 0x194   : > { %v932_v52 = vsub.f32 %v2944_v20, %v3707_v23  ;;  %v944_v56 = vsub.f32 %v2946_v21, %v3708_v9  ;;  %1929 = vmatprep.subr.bf16.mxu0 %v1928_v58  ;;  %v1930_v0 = vpack.c.bf16 %v903_v16, %v891_v3  ;;  %v3616_v23 = vand.u32 4294901760, %v3059_v8 }
 0x195   : > { %v3615_v31 = vand.u32 4294901760, %v3077_v47  ;;  %v938_v51 = vsub.f32 %v2916_v63, %v937_v38  ;;  %v950_v41 = vsub.f32 %v2926_v4, %v949_v62  ;;  %v956_v58 = vsub.f32 %v3009_v42, %v955_v36  ;;  %1220 = vmatmul.mubr.f32.vlgmr.msra.gmra.mrb[0].mxu1 %v2741_v12 }
 0x196   : > { %v968_v26 = vsub.f32 %v3011_v57, %v3614_v27  ;;  %v3709_v33 = vmov 0.0   ;;  %v1932_v16 = vpack.c.bf16 %v921_v39, %v909_v13  ;;  %v933_v3 = vand.u32 4294901760, %v932_v52  ;;  %1991 = vmatpush1.bf16.msk.msra.mxu1 %vm2808_vm4, %v3689_v14 }
 0x197   : > { %1081 = vmatprep.mubr.f32.mxu0 %v3709_v33  ;;  %v945_v11 = vand.u32 4294901760, %v944_v56  ;;  %1931 = vmatpush1.bf16.msra.mxu0 %v1930_v0  ;;  %v1934_v10 = vpack.c.bf16 %v927_v28, %v915_v17  ;;  %v962_v22 = vsub.f32 %v2930_v18, %v3613_v40  ;;  %v974_v9 = vsub.f32 %v2973_v35, %v3612_v7 }
 0x198   : > { %1933 = vmatprep.subr.bf16.mxu0 %v1932_v16  ;;  %1993 = vmatprep.subr.msk.bf16.mxu1 %vm2826_vm11, %v3689_v14  ;;  %v980_v39 = vsub.f32 %v3059_v8, %v3616_v23  ;;  %v992_v13 = vsub.f32 %v3077_v47, %v3615_v31  ;;  %v3620_v52 = vand.u32 4294901760, %v3049_v48  ;;  %v3619_v56 = vand.u32 4294901760, %v3051_v46 }
 0x199   : > { %v939_v17 = vand.u32 4294901760, %v938_v51  ;;  %v951_v28 = vand.u32 4294901760, %v950_v41  ;;  %v957_v0 = vand.u32 4294901760, %v956_v58  ;;  %v969_v16 = vand.u32 4294901760, %v968_v26  ;;  %1322 = vmatprep.mubr.f32.mxu1 %v3709_v33 }
 0x19a   : > { %v1936_v7 = vpack.c.bf16 %v945_v11, %v933_v3  ;;  %v3618_v40 = vand.u32 4294901760, %v3081_v61  ;;  %v3617_v27 = vand.u32 4294901760, %v3083_v29  ;;  %1995 = vmatpush1.bf16.msk.msra.mxu1 %vm2871_vm12, %v3689_v14  ;;  %v963_v31 = vand.u32 4294901760, %v962_v22 }
 0x19b   : > { %1935 = vmatpush1.bf16.msra.mxu0 %v1934_v10  ;;  %v975_v23 = vand.u32 4294901760, %v974_v9  ;;  %1997 = vmatprep.subr.msk.bf16.mxu1 %vm2894_vm5, %v3689_v14  ;;  %v981_v51 = vand.u32 4294901760, %v980_v39  ;;  %v993_v41 = vand.u32 4294901760, %v992_v13  ;;  %v986_v58 = vsub.f32 %v3049_v48, %v3620_v52 }
 0x19c   : > { %1937 = vmatprep.subr.bf16.mxu0 %v1936_v7  ;;  %v998_v26 = vsub.f32 %v3051_v46, %v3619_v56  ;;  %v1938_v3 = vpack.c.bf16 %v951_v28, %v939_v17  ;;  %v1940_v11 = vpack.c.bf16 %v969_v16, %v957_v0  ;;  %v1009_v10 = vand.u32 4294901760, %v3099_v60 }
 0x19d   : > { %v1021_v7 = vand.u32 4294901760, %v3114_v6  ;;  %v1004_v22 = vsub.f32 %v3081_v61, %v3618_v40  ;;  %v1016_v9 = vsub.f32 %v3083_v29, %v3617_v27  ;;  %v1027_v39 = vand.u32 4294901760, %v3184_v19 }
 0x19e   : > { %v3621_v13 = vand.u32 4294901760, %v3186_v15  ;;  %1999 = vmatpush1.bf16.msk.msra.mxu1 %vm2940_vm15, %v3689_v14  ;;  %v1942_v17 = vpack.c.bf16 %v975_v23, %v963_v31  ;;  %v1944_v28 = vpack.c.bf16 %v993_v41, %v981_v51  ;;  %v987_v0 = vand.u32 4294901760, %v986_v58 }
 0x19f   : > { %1939 = vmatpush1.bf16.msra.mxu0 %v1938_v3  ;;  %2001 = vmatprep.subr.msk.bf16.mxu1 %vm2961_vm10, %v3689_v14  ;;  %v999_v16 = vand.u32 4294901760, %v998_v26  ;;  %v1010_v27 = vsub.f32 %v3099_v60, %v1009_v10  ;;  %v1022_v3 = vsub.f32 %v3114_v6, %v1021_v7  ;;  %v1033_v40 = vand.u32 4294901760, %v3198_v34 }
 0x1a0   : > { %1941 = vmatprep.subr.bf16.mxu0 %v1940_v11  ;;  %v3622_v11 = vand.u32 4294901760, %v3200_v25  ;;  %v1005_v56 = vand.u32 4294901760, %v1004_v22  ;;  %v1017_v52 = vand.u32 4294901760, %v1016_v9  ;;  %v1028_v23 = vsub.f32 %v3184_v19, %v1027_v39 }
 0x1a1   : > { %v1040_v31 = vsub.f32 %v3186_v15, %v3621_v13  ;;  %v1946_v51 = vpack.c.bf16 %v999_v16, %v987_v0  ;;  %v1011_v41 = vand.u32 4294901760, %v1010_v27  ;;  %v1023_v58 = vand.u32 4294901760, %v1022_v3 }
 0x1a2   : > { %2003 = vmatpush1.bf16.msk.msra.mxu1 %vm3005_vm3, %v3689_v14  ;;  %v1034_v26 = vsub.f32 %v3198_v34, %v1033_v40  ;;  %v1046_v22 = vsub.f32 %v3200_v25, %v3622_v11  ;;  %v1948_v9 = vpack.c.bf16 %v1017_v52, %v1005_v56  ;;  %v3711_v11 = vld [vmem:[#allocation18_spill] sm:$0xff]  ;;  %vm3714_vm7 = vnez %v3699_v5 }
 0x1a3   : > { %1943 = vmatpush1.bf16.msra.mxu0 %v1942_v17  ;;  %2005 = vmatprep.subr.msk.bf16.mxu1 %vm3028_vm9, %v3689_v14  ;;  %v1029_v17 = vand.u32 4294901760, %v1028_v23  ;;  %v1041_v13 = vand.u32 4294901760, %v1040_v31  ;;  %vm3712_vm2 = vnez %v3711_v11  ;;  %v3717_v31 = vld [vmem:[#allocation14_spill] sm:$0xff]  ;;  %v3746_v4 = vand.u32 4294901760, %v3051_v46 }
 0x1a4   : > { %1945 = vmatprep.subr.bf16.mxu0 %v1944_v28  ;;  %v1950_v28 = vpack.c.bf16 %v1023_v58, %v1011_v41  ;;  %v1035_v0 = vand.u32 4294901760, %v1034_v26  ;;  %v1047_v16 = vand.u32 4294901760, %v1046_v22  ;;  %v3719_v58 = vld [vmem:[#allocation7_spill] sm:$0xff]  ;;  %v3720_v26 = vld [vmem:[#allocation8_spill] sm:$0xff]  ;;  %v3750_v46 = vand.u32 4294901760, %v3200_v25 }
 0x1a5   : > { %v1952_v3 = vpack.c.bf16 %v1041_v13, %v1029_v17  ;;  %v3715_v13 = vld [vmem:[#allocation13_spill] sm:$0xff]  ;;  %v3721_v22 = vand.u32 4294901760, %v3720_v26  ;;  %v3731_v26 = vld [vmem:[#allocation15_spill] sm:$0xff] }
 0x1a6   : > { %2007 = vmatpush1.bf16.msk.msra.mxu1 %vm3073_vm14, %v3689_v14  ;;  %v1954_v56 = vpack.c.bf16 %v1047_v16, %v1035_v0  ;;  %v3716_v23 = vand.u32 4294901760, %v3715_v13  ;;  %v3724_v0 = vand.u32 4294901760, %v2741_v12  ;;  %v3725_v16 = vand.u32 4294901760, %v2812_v55  ;;  %v3727_v13 = vld [vmem:[#allocation10_spill] sm:$0xff]  ;;  %v3735_v55 = vld [vmem:[#allocation12_spill] sm:$0xff] }
 0x1a7   : > { %1947 = vmatpush1.bf16.msra.mxu0 %v1946_v51  ;;  %2009 = vmatprep.subr.msk.bf16.mxu1 %vm3095_vm8, %v3689_v14  ;;  %v3718_v51 = vand.u32 4294901760, %v3717_v31  ;;  %v3729_v31 = vld [vmem:[#allocation11_spill] sm:$0xff] }
 0x1a8   : > { %1949 = vmatprep.subr.bf16.mxu0 %v1948_v9  ;;  %v3722_v9 = vld [vmem:[#allocation9_spill] sm:$0xff] }
 0x1a9   : > { %v2020_v41 = vpack.c.bf16 %v3718_v51, %v3716_v23  ;;  %v3723_v17 = vand.u32 4294901760, %v3722_v9  ;;  %v3728_v23 = vand.u32 4294901760, %v3727_v13  ;;  %v3730_v51 = vand.u32 4294901760, %v3729_v31 }
 0x1aa   : > { %2011 = vmatpush1.bf16.msk.msra.mxu1 %vm3712_vm2, %v3689_v14  ;;  %v3732_v9 = vand.u32 4294901760, %v3731_v26  ;;  %v2034_v13 = vpack.c.bf16 %v949_v62, %v937_v38  ;;  %v3745_v38 = vand.u32 4294901760, %v3049_v48 }
 0x1ab   : > { %1951 = vmatpush1.bf16.msra.mxu0 %v1950_v28  ;;  %2013 = vmatprep.subr.msk.bf16.mxu1 %vm3155_vm6, %v3689_v14  ;;  %v2022_v28 = vpack.c.bf16 %v3723_v17, %v3721_v22  ;;  %v3733_v22 = vld [vmem:[#allocation16_spill] sm:$0xff] }
 0x1ac   : > { %1953 = vmatprep.subr.bf16.mxu0 %v1952_v3  ;;  %v3726_v3 = vand.u32 4294901760, %v2814_v59  ;;  %v3734_v17 = vand.u32 4294901760, %v3733_v22  ;;  %v3737_v59 = vand.u32 4294901760, %v2853_v30  ;;  %v3741_v30 = vand.u32 4294901760, %v2930_v18 }
 0x1ad   : > { %v2042_v42 = vpack.c.bf16 %v3746_v4, %v3745_v38 }
 0x1ae   : > { %2015 = vmatpush1.bf16.msk.msra.mxu1 %vm3194_vm13, %v3689_v14  ;;  %v2028_v12 = vpack.c.bf16 %v3734_v17, %v3732_v9 }
 0x1af   : > { %1955 = vmatpush1.bf16.msra.mxu0 %v1954_v56  ;;  %2017 = vmatprep.subr.msk.bf16.mxu1 %vm3714_vm7, %v3689_v14  ;;  %v2024_v56 = vpack.c.bf16 %v3726_v3, %v3725_v16  ;;  %v3738_v16 = vand.u32 4294901760, %v2944_v20  ;;  %v3739_v3 = vand.u32 4294901760, %v2946_v21  ;;  %v3742_v20 = vand.u32 4294901760, %v2973_v35 }
 0x1b0   : > { %v2046_v35 = vpack.c.bf16 %v1021_v7, %v1009_v10 }
 0x1b1   : > { %v2038_v21 = vpack.c.bf16 %v3742_v20, %v3741_v30 }
 0x1b2   : > { %1083 = vmatmul.mubr.f32.vlgmr.msra.gmra.mrb[32].mxu0 %v3719_v58  ;;  %2019 = vmatpush1.bf16.msk.msra.mxu1 %vm3239_vm0, %v3689_v14 }
 0x1b3   : > { %2021 = vmatprep.subr.bf16.mxu1 %v2020_v41  ;;  %v2026_v41 = vpack.c.bf16 %v3730_v51, %v3728_v23  ;;  %v3740_v23 = vand.u32 4294901760, %v3011_v57  ;;  %v3743_v51 = vand.u32 4294901760, %v3059_v8  ;;  %v3748_v57 = vand.u32 4294901760, %v3083_v29 }
 0x1b4   : > { %v3749_v8 = vand.u32 4294901760, %v3186_v15  ;;  %v2050_v29 = vpack.c.bf16 %v3750_v46, %v1033_v40 }
 0x1b5   : > { %1326 = vmatmul.mubr.f32.vlgmr.msra.gmra.mrb[0].mxu1 %v3724_v0  ;;  %v3736_v0 = vand.u32 4294901760, %v3735_v55  ;;  %v2036_v31 = vpack.c.bf16 %v3740_v23, %v955_v36  ;;  %v3747_v36 = vand.u32 4294901760, %v3081_v61 }
 0x1b6   : > { %2023 = vmatpush1.bf16.msra.mxu1 %v2022_v28  ;;  %1492 = vmatprep.mubr.f32.mxu1 %v3709_v33  ;;  %v2048_v48 = vpack.c.bf16 %v3749_v8, %v1027_v39 }
 0x1b7   : > { %2025 = vmatprep.subr.bf16.mxu1 %v2024_v56  ;;  %v2030_v28 = vpack.c.bf16 %v3737_v59, %v3736_v0  ;;  %v2032_v56 = vpack.c.bf16 %v3739_v3, %v3738_v16  ;;  %v2044_v18 = vpack.c.bf16 %v3748_v57, %v3747_v36 }
 0x1ba   : > { %2027 = vmatpush1.bf16.msra.mxu1 %v2026_v41  ;;  %v3744_v41 = vand.u32 4294901760, %v3077_v47 }
 0x1bb   : > { %2029 = vmatprep.subr.bf16.mxu1 %v2028_v12 }
 0x1bc   : > { %v2040_v63 = vpack.c.bf16 %v3744_v41, %v3743_v51 }
 0x1be   : > { %2031 = vmatpush1.bf16.msra.mxu1 %v2030_v28 }
 0x1bf   : > { %2033 = vmatprep.subr.bf16.mxu1 %v2032_v56 }
 0x1c2   : > { %2035 = vmatpush1.bf16.msra.mxu1 %v2034_v13 }
 0x1c3   : > { %2037 = vmatprep.subr.bf16.mxu1 %v2036_v31 }
 0x1c6   : > { %2039 = vmatpush1.bf16.msra.mxu1 %v2038_v21 }
 0x1c7   : > { %2041 = vmatprep.subr.bf16.mxu1 %v2040_v63 }
 0x1ca   : > { %2043 = vmatpush1.bf16.msra.mxu1 %v2042_v42 }
 0x1cb   : > { %2045 = vmatprep.subr.bf16.mxu1 %v2044_v18 }
 0x1ce   : > { %2047 = vmatpush1.bf16.msra.mxu1 %v2046_v35 }
 0x1cf   : > { %2049 = vmatprep.subr.bf16.mxu1 %v2048_v48 }
 0x1d2   : > { %2051 = vmatpush1.bf16.msra.mxu1 %v2050_v29 }
 0x1d3   : > { %2053 = vmatprep.subr.msk.bf16.mxu1 %vm2788_vm1, %v3689_v14  ;;  %vm1604_vm1 = vcmp.lt.f32.partialorder %v3751_v44, inf }
 0x1d5   : > { %1494 = vmatmul.mubr.f32.vlgmr.msra.gmra.mrb[0].mxu1 %v3719_v58 }
 0x1d6   : > { %2055 = vmatpush1.bf16.msk.msra.mxu1 %vm2808_vm4, %v3689_v14  ;;  %1596 = vmatprep.mubr.f32.mxu1 %v3709_v33  ;;  %vm1605_vm4 = vcmp.lt.f32.partialorder %v3752_v45, inf }
 0x1d7   : > { %2057 = vmatprep.subr.msk.bf16.mxu1 %vm2826_vm11, %v3689_v14 }
 0x1da   : > { %2059 = vmatpush1.bf16.msk.msra.mxu1 %vm2871_vm12, %v3689_v14 }
 0x1db   : > { %2061 = vmatprep.subr.msk.bf16.mxu1 %vm2894_vm5, %v3689_v14 }
 0x1de   : > { %2063 = vmatpush1.bf16.msk.msra.mxu1 %vm2940_vm15, %v3689_v14 }
 0x1df   : > { %2065 = vmatprep.subr.msk.bf16.mxu1 %vm2961_vm10, %v3689_v14 }
 0x1e2   : > { %2067 = vmatpush1.bf16.msk.msra.mxu1 %vm3005_vm3, %v3689_v14 }
 0x1e3   : > { %2069 = vmatprep.subr.msk.bf16.mxu1 %vm3028_vm9, %v3689_v14 }
 0x1e6   : > { %2071 = vmatpush1.bf16.msk.msra.mxu1 %vm3073_vm14, %v3689_v14 }
 0x1e7   : > { %2073 = vmatprep.subr.msk.bf16.mxu1 %vm3095_vm8, %v3689_v14 }
 0x1ea   : > { %2075 = vmatpush1.bf16.msk.msra.mxu1 %vm3712_vm2, %v3689_v14 }
 0x1eb   : > { %2077 = vmatprep.subr.msk.bf16.mxu1 %vm3155_vm6, %v3689_v14 }
 0x1ee   : > { %2079 = vmatpush1.bf16.msk.msra.mxu1 %vm3194_vm13, %v3689_v14 }
 0x1ef   : > { %2081 = vmatprep.subr.msk.bf16.mxu1 %vm3714_vm7, %v3689_v14 }
 0x1f2   : > { %2083 = vmatpush1.bf16.msk.msra.mxu1 %vm3239_vm0, %v3689_v14 }
 0x1f5   : > { %1598 = vmatmul.mubr.f32.vlgmr.msra.gmra.mrb[0].mxu1 %v3719_v58 }
 0x285   : > { %v1084_v19 = vpop.f32.mrb[32].mxu0 }
 0x286   : > { %v1086_v37 = vpop.f32.mrb[33].mxu0 }
 0x2c8   : > { %v1599_v49 = vpop.f32.mrb[0].mxu1 }
 0x2c9   : > { %v2084_v32 = vadd.f32 %v1599_v49, %v1084_v19  ;;  %v1601_v1 = vpop.f32.mrb[1].mxu1 }
 0x2ca   : > { %v2085_v24 = vadd.f32 %v1601_v1, %v1086_v37 }
 0x2cb   : > { %v1610_v50 = vsel %vm1604_vm1, %v2084_v32, 0.0 }
 0x2cc   : > { %v1611_v14 = vsel %vm1605_vm4, %v2085_v24, 0.0 }
 0x2cd   : > { %v1614_v54 = vcombine.low %v1610_v50, %v1611_v14 }
 0x2cf   : > { %1616 = vst [vmem:[%s206_s23] sm:$0xff] %v1614_v54 }
 0x2d0   : > { %2164 = shalt.err (!%p2161_p5)
}
 0x2d1   : > { %s2165_s7 = scalar_lea.hbm %s3517_s29, 128  ;;  %s2169_s10 = scalar_lea.hbm %s3567_s3, 256 }
 0x2d2   : > { %p2166_p6 = scmp.ne.s32.totalorder %s3517_s29, %s2165_s7  ;;  %p2170_p10 = scmp.lt.u32.totalorder %s3517_s29, %s3567_s3 }
 0x2d3   : > { %p2171_p11 = scmp.lt.u32.totalorder %s2169_s10, %s2165_s7  ;;  %p2173_p13 = scmp.lt.u32.totalorder %s2165_s7, %s3517_s29 }
 0x2d4   : > { %p2167_p7 = pnand %p2166_p6, %p2294_p4 }
 0x2d5   : > { %p2172_p12 = por %p2171_p11, %p2170_p10 }
 0x2d6   : > { %p2168_p9 = pneg %p2167_p7 }
 0x2d7   : > { %p2174_p0 = por %p2173_p13, %p2172_p12 }
 0x2d9   : > { %p2175_p1 = pnand %p2174_p0, %p2168_p9 }
 0x2db   : > { %2178 = shalt.err (!%p2175_p1)
}
 0x2dc   : > { %2094 = dma.vmem_to_hbm [thread:$0]  (%p2294_p4), %s3519_s26, 128, %s3517_s29, %s1618_s30  }
 0x2dd PF: > { %p2100_p2 = scmp.ge.s32.totalorder %s2229_s17, 2  ;;  %s1646_s19 = sand.u32 1, %s2209_s12  }
 0x2de   : > { %s1647_s21 = scalar_lea.sflag [#allocation3], %s1646_s19 }
 0x2df   : > { %p2097_p3 = pnand %p2100_p2, %p2301_p8 }
 0x2e1   : > { %2204 = dma.done.wait (!%p2097_p3), %s1647_s21, 128  }
 0x2e2   : > { %2206 = vsyncadd (!%p2097_p3), %s1647_s21, 4294967168  ;;  %s16_s17 = sadd.s32 1, %s2229_s17   ;;  %s3753_s12 = smov %s2213_s13 }
 0x2e3   : > { %p13_p5 = scmp.ge.s32.totalorder %s16_s17, 4   ;;  %s3754_s13 = smov %s2217_s14 }
 0x2e4   : > { %s3755_s14 = smov %s2307_s25  ;;  %s3756_s15 = smov %s2225_s16 }
 0x2e5   : > { %s3757_s16 = smov %s3759_s20  ;;  %15 = sbr.rel (!%p13_p5) target bundleno = 4 (0x4), region = 73 }
 0x2ec   :  { %1652 = vsyncpa [#allocation3], 1 }
 0x2ed   :  { %1654 = vsyncpa [#allocation3 + $0x1], 1 }

</bundles_post_ra>
